<compile_context>
chip_gen: v7x
topology: tpu7x:2x2x1
jax: 0.10.0
libtpu: 0.0.40
codegen_flags: <defaults>
</compile_context>

<pallas_src>
import numpy as np

import jax
import jax.numpy as jnp
from jax.experimental import pallas as pl
from jax.experimental.pallas import tpu as pltpu

EPS = 1e-5
MATMUL_DTYPE = jnp.bfloat16          # MXU input dtype (accumulation stays f32)


def _tpu_vmem_capacity_bytes():
    """Physical per-core VMEM (v5e/v6e: 128 MiB, v7x: 64 MiB); safe default."""
    try:
        cap = int(getattr(pltpu.get_tpu_info(), "vmem_capacity_bytes", 0))
        if cap > 0:
            return cap
    except Exception:
        pass
    return 64 * 1024 * 1024          # conservative (v7x per-TensorCore VMEM)


_VMEM_CAP = _tpu_vmem_capacity_bytes()
_VMEM_LIMIT = int(_VMEM_CAP * 0.85)   # scoped-VMEM limit handed to Mosaic
_VMEM_BUDGET = int(_VMEM_CAP * 0.65)  # what we plan our own buffers against


def _lane_tiles(m):
    """Candidate lane tiles: multiples of 128 dividing m, largest first; else [m]."""
    cands = [t for t in (4096, 2048, 1024, 512, 256, 128) if m % t == 0]
    return cands if cands else [m]


# ---------------------------------------------------------------------------
# Fused path: conv + batch stats + BN + (residual) + ReLU in ONE pallas_call.
# ---------------------------------------------------------------------------
def _make_fused_kernel(m_total, has_residual, num_tiles, tm):
    inv_m = 1.0 / float(m_total)

    def kernel(*refs):
        if has_residual:
            (wt_ref, gamma_ref, beta_ref, pt_ref, res_ref,
             out_ref, conv_scr, sum_scr, sumsq_scr) = refs
        else:
            (wt_ref, gamma_ref, beta_ref, pt_ref,
             out_ref, conv_scr, sum_scr, sumsq_scr) = refs
            res_ref = None

        i = pl.program_id(0)

        @pl.when(i == 0)
        def _init():
            sum_scr[...] = jnp.zeros_like(sum_scr)
            sumsq_scr[...] = jnp.zeros_like(sumsq_scr)

        # Tap-packed conv tile: single bf16 MXU matmul with K = 9*Cin, f32 acc.
        acc = jnp.dot(wt_ref[...], pt_ref[...],
                      preferred_element_type=jnp.float32)

        # Per-channel batch statistics in exact f32 on the VPU/XLU (lane
        # reduction); keeps the MXU free and avoids bf16-demoted f32 dots.
        sum_scr[...] += jnp.sum(acc, axis=1, keepdims=True)
        sumsq_scr[...] += jnp.sum(acc * acc, axis=1, keepdims=True)

        # Park the pre-BN conv tile in the resident f32 VMEM slab.
        if num_tiles == 1:
            conv_scr[...] = acc                         # static store
        else:
            off = pl.multiple_of(i * tm, tm)            # 128-aligned lane offset
            conv_scr[:, pl.ds(off, tm)] = acc

        @pl.when(i == num_tiles - 1)
        def _epilogue():
            mean = sum_scr[...] * inv_m                    # (Cout, 1)
            var = sumsq_scr[...] * inv_m - mean * mean     # biased var (train BN)
            inv_std = jax.lax.rsqrt(var + EPS)
            scale = gamma_ref[...] * inv_std
            shift = beta_ref[...] - mean * scale
            y = conv_scr[...] * scale + shift              # lane broadcast
            if has_residual:
                y = y + res_ref[...]
            out_ref[...] = jnp.maximum(y, 0.0).astype(out_ref.dtype)

    return kernel


def _half_block_fused(patches_t, wt, gamma, beta, residual_t, out_dtype, tm):
    k_dim, m = patches_t.shape
    cout = wt.shape[0]
    has_res = residual_t is not None
    num_tiles = m // tm

    # Constant-index blocks (weights / gamma / beta / residual / output) are
    # fetched or written exactly once; only the patch slab streams per tile.
    in_specs = [
        pl.BlockSpec((cout, k_dim), lambda i: (0, 0)),   # packed 3x3 weights
        pl.BlockSpec((cout, 1), lambda i: (0, 0)),       # gamma
        pl.BlockSpec((cout, 1), lambda i: (0, 0)),       # beta
        pl.BlockSpec((k_dim, tm), lambda i: (0, i)),     # streamed im2col tiles
    ]
    args = [wt, gamma, beta, patches_t]
    if has_res:
        in_specs.append(pl.BlockSpec((cout, m), lambda i: (0, 0)))  # residual
        args.append(residual_t)

    return pl.pallas_call(
        _make_fused_kernel(m, has_res, num_tiles, tm),
        grid=(num_tiles,),
        in_specs=in_specs,
        out_specs=pl.BlockSpec((cout, m), lambda i: (0, 0)),  # resident output
        out_shape=jax.ShapeDtypeStruct((cout, m), out_dtype),
        scratch_shapes=[
            pltpu.VMEM((cout, m), jnp.float32),   # resident pre-BN conv slab
            pltpu.VMEM((cout, 1), jnp.float32),   # per-channel sum
            pltpu.VMEM((cout, 1), jnp.float32),   # per-channel sum of squares
        ],
        compiler_params=pltpu.CompilerParams(
            dimension_semantics=("arbitrary",),   # stats / slab accumulate serially
            vmem_limit_bytes=_VMEM_LIMIT),
    )(*args)


# ---------------------------------------------------------------------------
# Fallback path (large shapes): two pallas_calls, conv_t round-trips as bf16.
# ---------------------------------------------------------------------------
def _conv_stats_kernel(wt_ref, pt_ref, conv_ref, sum_ref, sumsq_ref):
    @pl.when(pl.program_id(0) == 0)
    def _init():
        sum_ref[...] = jnp.zeros_like(sum_ref)
        sumsq_ref[...] = jnp.zeros_like(sumsq_ref)

    acc = jnp.dot(wt_ref[...], pt_ref[...], preferred_element_type=jnp.float32)
    conv_ref[...] = acc.astype(conv_ref.dtype)            # bf16 HBM round trip
    sum_ref[...] += jnp.sum(acc, axis=1, keepdims=True)   # exact f32 stats (VPU/XLU)
    sumsq_ref[...] += jnp.sum(acc * acc, axis=1, keepdims=True)


def _make_bn_act_kernel(m_total, has_residual):
    inv_m = 1.0 / float(m_total)

    def kernel(sum_ref, sumsq_ref, gamma_ref, beta_ref, conv_ref, *rest):
        if has_residual:
            res_ref, out_ref = rest
        else:
            (out_ref,) = rest
        mean = sum_ref[...] * inv_m
        var = sumsq_ref[...] * inv_m - mean * mean
        inv_std = jax.lax.rsqrt(var + EPS)
        scale = gamma_ref[...] * inv_std
        shift = beta_ref[...] - mean * scale
        y = conv_ref[...].astype(jnp.float32) * scale + shift
        if has_residual:
            y = y + res_ref[...]
        out_ref[...] = jnp.maximum(y, 0.0).astype(out_ref.dtype)

    return kernel


def _half_block_two_pass(patches_t, wt, gamma, beta, residual_t, out_dtype):
    k_dim, m = patches_t.shape
    cout = wt.shape[0]
    has_res = residual_t is not None
    elem = patches_t.dtype.itemsize
    wt_bytes = 2 * cout * k_dim * elem

    tm = _lane_tiles(m)[-1]
    for t in _lane_tiles(m):
        streamed = 2 * t * (k_dim * elem + cout * 2 + cout * 4 * (2 if has_res else 1))
        if wt_bytes + streamed <= _VMEM_BUDGET:
            tm = t
            break
    grid = (m // tm,)

    conv_t, sums, sumsq = pl.pallas_call(
        _conv_stats_kernel,
        grid=grid,
        in_specs=[pl.BlockSpec((cout, k_dim), lambda i: (0, 0)),
                  pl.BlockSpec((k_dim, tm), lambda i: (0, i))],
        out_specs=[pl.BlockSpec((cout, tm), lambda i: (0, i)),
                   pl.BlockSpec((cout, 1), lambda i: (0, 0)),
                   pl.BlockSpec((cout, 1), lambda i: (0, 0))],
        out_shape=(jax.ShapeDtypeStruct((cout, m), MATMUL_DTYPE),
                   jax.ShapeDtypeStruct((cout, 1), jnp.float32),
                   jax.ShapeDtypeStruct((cout, 1), jnp.float32)),
        compiler_params=pltpu.CompilerParams(
            dimension_semantics=("arbitrary",),
            vmem_limit_bytes=_VMEM_LIMIT),
    )(wt, patches_t)

    in_specs = [pl.BlockSpec((cout, 1), lambda i: (0, 0)),
                pl.BlockSpec((cout, 1), lambda i: (0, 0)),
                pl.BlockSpec((cout, 1), lambda i: (0, 0)),
                pl.BlockSpec((cout, 1), lambda i: (0, 0)),
                pl.BlockSpec((cout, tm), lambda i: (0, i))]
    args = [sums, sumsq, gamma, beta, conv_t]
    if has_res:
        in_specs.append(pl.BlockSpec((cout, tm), lambda i: (0, i)))
        args.append(residual_t)

    return pl.pallas_call(
        _make_bn_act_kernel(m, has_res),
        grid=grid,
        in_specs=in_specs,
        out_specs=pl.BlockSpec((cout, tm), lambda i: (0, i)),
        out_shape=jax.ShapeDtypeStruct((cout, m), out_dtype),
        compiler_params=pltpu.CompilerParams(
            dimension_semantics=("parallel",),   # shards across v7x's 2 TCs
            vmem_limit_bytes=_VMEM_LIMIT),
    )(*args)


# ---------------------------------------------------------------------------
# Dispatcher: fuse when the resident slab fits VMEM, else two-pass fallback.
# ---------------------------------------------------------------------------
def _half_block(patches_t, wt, gamma, beta, residual_t, out_dtype):
    """conv3x3 (tap-packed) -> BatchNorm(batch stats) -> (+residual) -> ReLU.

    patches_t  : (9*Cin, M) bf16   channel-major im2col slab (M on lanes)
    wt         : (Cout, 9*Cin) bf16
    gamma/beta : (Cout, 1) f32
    residual_t : (Cout, M) f32 or None
    returns    : (Cout, M) out_dtype
    """
    k_dim, m = patches_t.shape
    cout = wt.shape[0]
    has_res = residual_t is not None
    elem = patches_t.dtype.itemsize

    wt_bytes = 2 * cout * k_dim * elem                       # double-buffered weights
    resident = cout * m * 4                                  # f32 conv slab (scratch)
    resident += cout * m * np.dtype(out_dtype).itemsize      # resident output block
    if has_res:
        resident += cout * m * 4                             # resident f32 residual
    stream_budget = _VMEM_BUDGET - resident - wt_bytes

    fused_tm = None
    for t in _lane_tiles(m):                                 # largest fitting tile;
        if 2 * k_dim * t * elem <= stream_budget:            # serial axis => no grid>=2
            fused_tm = t
            break

    if fused_tm is not None:
        return _half_block_fused(patches_t, wt, gamma, beta, residual_t,
                                 out_dtype, fused_tm)
    return _half_block_two_pass(patches_t, wt, gamma, beta, residual_t, out_dtype)


# ---------------------------------------------------------------------------
# Wrapper-side layout plumbing (XLA glue).
# ---------------------------------------------------------------------------
def _im2col_t(x_cnhw):
    """(C, N, H, W) -> (9*C, N*H*W) im2col slab for a 3x3, pad=1, stride=1 conv.

    Row index = (kh*3 + kw)*C + c, matching _weights_t column order.  The input
    is already bf16 (cast BEFORE the 9x slab is materialized).
    """
    c, n, h, w = x_cnhw.shape
    xp = jnp.pad(x_cnhw, ((0, 0), (0, 0), (1, 1), (1, 1)))
    taps = [xp[:, :, kh:kh + h, kw:kw + w].reshape(c, n * h * w)
            for kh in range(3) for kw in range(3)]
    return jnp.concatenate(taps, axis=0)


def _weights_t(w_oihw):
    """(Cout, Cin, 3, 3) -> (Cout, 9*Cin), column index = (kh*3+kw)*Cin + ci."""
    cout, cin = w_oihw.shape[0], w_oihw.shape[1]
    return jnp.transpose(w_oihw, (0, 2, 3, 1)).reshape(cout, 9 * cin)


@jax.jit
def basic_block_forward(x_nchw, w1, g1, b1, w2, g2, b2):
    """Pallas BasicBlock forward (stride=1, no downsample). x_nchw: (N,C,H,W) f32."""
    n, c, h, w = x_nchw.shape
    planes = w1.shape[0]
    m = n * h * w

    # Channel-major (C, N, H, W): M = N*H*W lives on the lane axis in-kernel.
    x_t = jnp.transpose(x_nchw, (1, 0, 2, 3)).astype(jnp.float32)

    # half 1: conv1 -> bn1 -> relu.  Cast to bf16 BEFORE im2col; y1 emitted in
    # bf16 since it is only ever consumed as conv2's bf16 MXU input.
    y1 = _half_block(
        _im2col_t(x_t.astype(MATMUL_DTYPE)),
        _weights_t(w1).astype(MATMUL_DTYPE),
        g1.reshape(-1, 1).astype(jnp.float32),
        b1.reshape(-1, 1).astype(jnp.float32),
        residual_t=None,
        out_dtype=MATMUL_DTYPE)

    # half 2: conv2 -> bn2 -> (+identity) -> relu.  Identity path stays f32
    # (inplanes == planes, stride == 1, no downsample).
    identity_t = x_t.reshape(c, m)
    y2 = _half_block(
        _im2col_t(y1.reshape(planes, n, h, w)),
        _weights_t(w2).astype(MATMUL_DTYPE),
        g2.reshape(-1, 1).astype(jnp.float32),
        b2.reshape(-1, 1).astype(jnp.float32),
        residual_t=identity_t,
        out_dtype=jnp.float32)

    return jnp.transpose(y2.reshape(planes, n, h, w), (1, 0, 2, 3))


def reference_forward(x_nchw, w1, g1, b1, w2, g2, b2):
    """Pure-JAX f32 reference (NCHW), matching PyTorch BasicBlock in train mode."""
    def conv(x, w):
        return jax.lax.conv_general_dilated(
            x, w, window_strides=(1, 1), padding=((1, 1), (1, 1)),
            dimension_numbers=("NCHW", "OIHW", "NCHW"))

    def bn_train(x, g, b):
        mean = jnp.mean(x, axis=(0, 2, 3), keepdims=True)
        var = jnp.mean((x - mean) ** 2, axis=(0, 2, 3), keepdims=True)
        xn = (x - mean) * jax.lax.rsqrt(var + EPS)
        return xn * g.reshape(1, -1, 1, 1) + b.reshape(1, -1, 1, 1)

    out = jax.nn.relu(bn_train(conv(x_nchw, w1), g1, b1))
    out = bn_train(conv(out, w2), g2, b2) + x_nchw
    return jax.nn.relu(out)


if __name__ == "__main__":
    # BasicBlock(inplanes=8, planes=8, stride=1, downsample=None)
    N, C, H, W = 2, 8, 16, 16
    inplanes = planes = C

    key = jax.random.PRNGKey(0)
    k_x, k_w1, k_w2, k_g1, k_b1, k_g2, k_b2 = jax.random.split(key, 7)

    x = jax.random.normal(k_x, (N, C, H, W), jnp.float32)
    w1 = jax.random.normal(k_w1, (planes, inplanes, 3, 3), jnp.float32) * 0.1
    w2 = jax.random.normal(k_w2, (planes, planes, 3, 3), jnp.float32) * 0.1
    g1 = 1.0 + 0.1 * jax.random.normal(k_g1, (planes,), jnp.float32)
    b1 = 0.1 * jax.random.normal(k_b1, (planes,), jnp.float32)
    g2 = 1.0 + 0.1 * jax.random.normal(k_g2, (planes,), jnp.float32)
    b2 = 0.1 * jax.random.normal(k_b2, (planes,), jnp.float32)

    out = basic_block_forward(x, w1, g1, b1, w2, g2, b2)
    out = jax.block_until_ready(out)

    ref = reference_forward(x, w1, g1, b1, w2, g2, b2)
    assert out.shape == (N, C, H, W)
    # Tolerance reflects bf16 MXU inputs / bf16 y1 (all accumulation, batch
    # statistics and the BN epilogue are f32); the reference is f32 end-to-end.
    assert jnp.allclose(out, ref, rtol=5e-2, atol=5e-2), (
        "max abs err = %g" % float(jnp.max(jnp.abs(out - ref))))

    print("KERNEL_OK")
</pallas_src>

<mosaic_0001>
module attributes {stable_mosaic.version = 11 : i64} {
  func.func @kernel(%arg0: i32, %arg1: memref<8x72xbf16, #tpu.memory_space<vmem>>, %arg2: memref<8x1xf32, #tpu.memory_space<vmem>>, %arg3: memref<8x1xf32, #tpu.memory_space<vmem>>, %arg4: memref<72x512xbf16, #tpu.memory_space<vmem>>, %arg5: memref<8x512xbf16, #tpu.memory_space<vmem>>, %arg6: memref<8x512xf32, #tpu.memory_space<vmem>>, %arg7: memref<8x1xf32, #tpu.memory_space<vmem>>, %arg8: memref<8x1xf32, #tpu.memory_space<vmem>>) attributes {dimension_semantics = [#tpu.dimension_semantics<arbitrary>], iteration_bounds = array<i64: 1>, scalar_prefetch = 0 : i64, scratch_operands = 3 : i64, tpu.core_type = #tpu.core_type<tc>, window_params = [{pipeline_mode = #tpu.pipeline_mode<synchronous>, transform_indices = @transform_0, window_bounds = array<i64: 8, 72>}, {pipeline_mode = #tpu.pipeline_mode<synchronous>, transform_indices = @transform_1, window_bounds = array<i64: 8, 1>}, {pipeline_mode = #tpu.pipeline_mode<synchronous>, transform_indices = @transform_2, window_bounds = array<i64: 8, 1>}, {transform_indices = @transform_3, window_bounds = array<i64: 72, 512>}, {pipeline_mode = #tpu.pipeline_mode<synchronous>, transform_indices = @transform_4, window_bounds = array<i64: 8, 512>}]} {
    %c0_i32 = arith.constant 0 : i32
    %0 = arith.cmpi eq, %arg0, %c0_i32 : i32
    %1 = arith.extui %0 : i1 to i32
    %c0_i32_0 = arith.constant 0 : i32
    %2 = arith.cmpi ne, %1, %c0_i32_0 : i32
    scf.if %2 {
      %cst_18 = arith.constant 0.000000e+00 : f32
      %21 = vector.broadcast %cst_18 : f32 to vector<8x1xf32>
      %c0_19 = arith.constant 0 : index
      %c0_20 = arith.constant 0 : index
      %22 = vector.load %arg7[%c0_19, %c0_20] : memref<8x1xf32, #tpu.memory_space<vmem>>, vector<8x1xf32>
      tpu.vector_store %arg7[%c0_19, %c0_20], %21 {strides = array<i32>} : memref<8x1xf32, #tpu.memory_space<vmem>>, vector<8x1xf32>,
      %cst_21 = arith.constant 0.000000e+00 : f32
      %23 = vector.broadcast %cst_21 : f32 to vector<8x1xf32>
      %c0_22 = arith.constant 0 : index
      %c0_23 = arith.constant 0 : index
      %24 = vector.load %arg8[%c0_22, %c0_23] : memref<8x1xf32, #tpu.memory_space<vmem>>, vector<8x1xf32>
      tpu.vector_store %arg8[%c0_22, %c0_23], %23 {strides = array<i32>} : memref<8x1xf32, #tpu.memory_space<vmem>>, vector<8x1xf32>,
    } else {
    }
    %c0 = arith.constant 0 : index
    %c0_1 = arith.constant 0 : index
    %3 = vector.load %arg1[%c0, %c0_1] : memref<8x72xbf16, #tpu.memory_space<vmem>>, vector<8x72xbf16>
    %c0_2 = arith.constant 0 : index
    %c0_3 = arith.constant 0 : index
    %4 = vector.load %arg4[%c0_2, %c0_3] : memref<72x512xbf16, #tpu.memory_space<vmem>>, vector<72x512xbf16>
    %cst = arith.constant dense<0.000000e+00> : vector<8x512xf32>
    %5 = tpu.matmul %3, %4, %cst {dimension_numbers = #tpu.dot_dimension_numbers<[1], [0], [0], [1], [0, 0, 1, 1], [], []>} : vector<8x72xbf16>, vector<72x512xbf16>, vector<8x512xf32> -> vector<8x512xf32>
    %c0_4 = arith.constant 0 : index
    %c0_5 = arith.constant 0 : index
    %6 = vector.load %arg7[%c0_4, %c0_5] : memref<8x1xf32, #tpu.memory_space<vmem>>, vector<8x1xf32>
    %cst_6 = arith.constant dense<0.000000e+00> : vector<8xf32>
    %7 = vector.multi_reduction <add>, %5, %cst_6 [1] : vector<8x512xf32> to vector<8xf32>
    %8 = vector.shape_cast %7 : vector<8xf32> to vector<8x1xf32>
    %9 = arith.addf %6, %8 : vector<8x1xf32>
    %c0_7 = arith.constant 0 : index
    %c0_8 = arith.constant 0 : index
    %10 = vector.load %arg7[%c0_7, %c0_8] : memref<8x1xf32, #tpu.memory_space<vmem>>, vector<8x1xf32>
    tpu.vector_store %arg7[%c0_7, %c0_8], %9 {strides = array<i32>} : memref<8x1xf32, #tpu.memory_space<vmem>>, vector<8x1xf32>,
    %c0_9 = arith.constant 0 : index
    %c0_10 = arith.constant 0 : index
    %11 = vector.load %arg8[%c0_9, %c0_10] : memref<8x1xf32, #tpu.memory_space<vmem>>, vector<8x1xf32>
    %12 = arith.mulf %5, %5 : vector<8x512xf32>
    %cst_11 = arith.constant dense<0.000000e+00> : vector<8xf32>
    %13 = vector.multi_reduction <add>, %12, %cst_11 [1] : vector<8x512xf32> to vector<8xf32>
    %14 = vector.shape_cast %13 : vector<8xf32> to vector<8x1xf32>
    %15 = arith.addf %11, %14 : vector<8x1xf32>
    %c0_12 = arith.constant 0 : index
    %c0_13 = arith.constant 0 : index
    %16 = vector.load %arg8[%c0_12, %c0_13] : memref<8x1xf32, #tpu.memory_space<vmem>>, vector<8x1xf32>
    tpu.vector_store %arg8[%c0_12, %c0_13], %15 {strides = array<i32>} : memref<8x1xf32, #tpu.memory_space<vmem>>, vector<8x1xf32>,
    %c0_14 = arith.constant 0 : index
    %c0_15 = arith.constant 0 : index
    %17 = vector.load %arg6[%c0_14, %c0_15] : memref<8x512xf32, #tpu.memory_space<vmem>>, vector<8x512xf32>
    tpu.vector_store %arg6[%c0_14, %c0_15], %5 {strides = array<i32>} : memref<8x512xf32, #tpu.memory_space<vmem>>, vector<8x512xf32>,
    %c0_i32_16 = arith.constant 0 : i32
    %18 = arith.cmpi eq, %arg0, %c0_i32_16 : i32
    %19 = arith.extui %18 : i1 to i32
    %c0_i32_17 = arith.constant 0 : i32
    %20 = arith.cmpi ne, %19, %c0_i32_17 : i32
    scf.if %20 {
      %c0_18 = arith.constant 0 : index
      %c0_19 = arith.constant 0 : index
      %21 = vector.load %arg7[%c0_18, %c0_19] : memref<8x1xf32, #tpu.memory_space<vmem>>, vector<8x1xf32>
      %cst_20 = arith.constant 0.001953125 : f32
      %22 = vector.broadcast %cst_20 : f32 to vector<8x1xf32>
      %23 = arith.mulf %21, %22 : vector<8x1xf32>
      %c0_21 = arith.constant 0 : index
      %c0_22 = arith.constant 0 : index
      %24 = vector.load %arg8[%c0_21, %c0_22] : memref<8x1xf32, #tpu.memory_space<vmem>>, vector<8x1xf32>
      %cst_23 = arith.constant 0.001953125 : f32
      %25 = vector.broadcast %cst_23 : f32 to vector<8x1xf32>
      %26 = arith.mulf %24, %25 : vector<8x1xf32>
      %27 = arith.mulf %23, %23 : vector<8x1xf32>
      %28 = arith.subf %26, %27 : vector<8x1xf32>
      %cst_24 = arith.constant 9.99999974E-6 : f32
      %29 = vector.broadcast %cst_24 : f32 to vector<8x1xf32>
      %30 = arith.addf %28, %29 : vector<8x1xf32>
      %31 = math.rsqrt %30 : vector<8x1xf32>
      %c0_25 = arith.constant 0 : index
      %c0_26 = arith.constant 0 : index
      %32 = vector.load %arg2[%c0_25, %c0_26] : memref<8x1xf32, #tpu.memory_space<vmem>>, vector<8x1xf32>
      %33 = arith.mulf %32, %31 : vector<8x1xf32>
      %c0_27 = arith.constant 0 : index
      %c0_28 = arith.constant 0 : index
      %34 = vector.load %arg3[%c0_27, %c0_28] : memref<8x1xf32, #tpu.memory_space<vmem>>, vector<8x1xf32>
      %35 = arith.mulf %23, %33 : vector<8x1xf32>
      %36 = arith.subf %34, %35 : vector<8x1xf32>
      %c0_29 = arith.constant 0 : index
      %c0_30 = arith.constant 0 : index
      %37 = vector.load %arg6[%c0_29, %c0_30] : memref<8x512xf32, #tpu.memory_space<vmem>>, vector<8x512xf32>
      %38 = vector.broadcast %33 : vector<8x1xf32> to vector<8x512xf32>
      %39 = arith.mulf %37, %38 : vector<8x512xf32>
      %40 = vector.broadcast %36 : vector<8x1xf32> to vector<8x512xf32>
      %41 = arith.addf %39, %40 : vector<8x512xf32>
      %cst_31 = arith.constant 0.000000e+00 : f32
      %42 = vector.broadcast %cst_31 : f32 to vector<8x512xf32>
      %43 = arith.maximumf %41, %42 : vector<8x512xf32>
      %44 = arith.truncf %43 : vector<8x512xf32> to vector<8x512xbf16>
      %c0_32 = arith.constant 0 : index
      %c0_33 = arith.constant 0 : index
      %45 = vector.load %arg5[%c0_32, %c0_33] : memref<8x512xbf16, #tpu.memory_space<vmem>>, vector<8x512xbf16>
      tpu.vector_store %arg5[%c0_32, %c0_33], %44 {strides = array<i32>} : memref<8x512xbf16, #tpu.memory_space<vmem>>, vector<8x512xbf16>,
    } else {
    }
    return
  }
  func.func @transform_0(%arg0: i32) -> (i32, i32) {
    %c0_i32 = arith.constant 0 : i32
    %c0_i32_0 = arith.constant 0 : i32
    %c0_i32_1 = arith.constant 0 : i32
    return %c0_i32, %c0_i32_0 : i32, i32
  }
  func.func @transform_1(%arg0: i32) -> (i32, i32) {
    %c0_i32 = arith.constant 0 : i32
    %c0_i32_0 = arith.constant 0 : i32
    %c0_i32_1 = arith.constant 0 : i32
    return %c0_i32, %c0_i32_0 : i32, i32
  }
  func.func @transform_2(%arg0: i32) -> (i32, i32) {
    %c0_i32 = arith.constant 0 : i32
    %c0_i32_0 = arith.constant 0 : i32
    %c0_i32_1 = arith.constant 0 : i32
    return %c0_i32, %c0_i32_0 : i32, i32
  }
  func.func @transform_3(%arg0: i32) -> (i32, i32) {
    %c0_i32 = arith.constant 0 : i32
    %c0_i32_0 = arith.constant 0 : i32
    return %c0_i32, %arg0 : i32, i32
  }
  func.func @transform_4(%arg0: i32) -> (i32, i32) {
    %c0_i32 = arith.constant 0 : i32
    %c0_i32_0 = arith.constant 0 : i32
    %c0_i32_1 = arith.constant 0 : i32
    return %c0_i32, %c0_i32_0 : i32, i32
  }
}

module attributes {stable_mosaic.version = 11 : i64} {
  func.func @kernel(%arg0: i32, %arg1: memref<8x72xbf16, #tpu.memory_space<vmem>>, %arg2: memref<8x1xf32, #tpu.memory_space<vmem>>, %arg3: memref<8x1xf32, #tpu.memory_space<vmem>>, %arg4: memref<72x512xbf16, #tpu.memory_space<vmem>>, %arg5: memref<8x512xf32, #tpu.memory_space<vmem>>, %arg6: memref<8x512xf32, #tpu.memory_space<vmem>>, %arg7: memref<8x512xf32, #tpu.memory_space<vmem>>, %arg8: memref<8x1xf32, #tpu.memory_space<vmem>>, %arg9: memref<8x1xf32, #tpu.memory_space<vmem>>) attributes {dimension_semantics = [#tpu.dimension_semantics<arbitrary>], iteration_bounds = array<i64: 1>, scalar_prefetch = 0 : i64, scratch_operands = 3 : i64, tpu.core_type = #tpu.core_type<tc>, window_params = [{pipeline_mode = #tpu.pipeline_mode<synchronous>, transform_indices = @transform_0, window_bounds = array<i64: 8, 72>}, {pipeline_mode = #tpu.pipeline_mode<synchronous>, transform_indices = @transform_1, window_bounds = array<i64: 8, 1>}, {pipeline_mode = #tpu.pipeline_mode<synchronous>, transform_indices = @transform_2, window_bounds = array<i64: 8, 1>}, {transform_indices = @transform_3, window_bounds = array<i64: 72, 512>}, {pipeline_mode = #tpu.pipeline_mode<synchronous>, transform_indices = @transform_4, window_bounds = array<i64: 8, 512>}, {pipeline_mode = #tpu.pipeline_mode<synchronous>, transform_indices = @transform_5, window_bounds = array<i64: 8, 512>}]} {
    %c0_i32 = arith.constant 0 : i32
    %0 = arith.cmpi eq, %arg0, %c0_i32 : i32
    %1 = arith.extui %0 : i1 to i32
    %c0_i32_0 = arith.constant 0 : i32
    %2 = arith.cmpi ne, %1, %c0_i32_0 : i32
    scf.if %2 {
      %cst_18 = arith.constant 0.000000e+00 : f32
      %21 = vector.broadcast %cst_18 : f32 to vector<8x1xf32>
      %c0_19 = arith.constant 0 : index
      %c0_20 = arith.constant 0 : index
      %22 = vector.load %arg8[%c0_19, %c0_20] : memref<8x1xf32, #tpu.memory_space<vmem>>, vector<8x1xf32>
      tpu.vector_store %arg8[%c0_19, %c0_20], %21 {strides = array<i32>} : memref<8x1xf32, #tpu.memory_space<vmem>>, vector<8x1xf32>,
      %cst_21 = arith.constant 0.000000e+00 : f32
      %23 = vector.broadcast %cst_21 : f32 to vector<8x1xf32>
      %c0_22 = arith.constant 0 : index
      %c0_23 = arith.constant 0 : index
      %24 = vector.load %arg9[%c0_22, %c0_23] : memref<8x1xf32, #tpu.memory_space<vmem>>, vector<8x1xf32>
      tpu.vector_store %arg9[%c0_22, %c0_23], %23 {strides = array<i32>} : memref<8x1xf32, #tpu.memory_space<vmem>>, vector<8x1xf32>,
    } else {
    }
    %c0 = arith.constant 0 : index
    %c0_1 = arith.constant 0 : index
    %3 = vector.load %arg1[%c0, %c0_1] : memref<8x72xbf16, #tpu.memory_space<vmem>>, vector<8x72xbf16>
    %c0_2 = arith.constant 0 : index
    %c0_3 = arith.constant 0 : index
    %4 = vector.load %arg4[%c0_2, %c0_3] : memref<72x512xbf16, #tpu.memory_space<vmem>>, vector<72x512xbf16>
    %cst = arith.constant dense<0.000000e+00> : vector<8x512xf32>
    %5 = tpu.matmul %3, %4, %cst {dimension_numbers = #tpu.dot_dimension_numbers<[1], [0], [0], [1], [0, 0, 1, 1], [], []>} : vector<8x72xbf16>, vector<72x512xbf16>, vector<8x512xf32> -> vector<8x512xf32>
    %c0_4 = arith.constant 0 : index
    %c0_5 = arith.constant 0 : index
    %6 = vector.load %arg8[%c0_4, %c0_5] : memref<8x1xf32, #tpu.memory_space<vmem>>, vector<8x1xf32>
    %cst_6 = arith.constant dense<0.000000e+00> : vector<8xf32>
    %7 = vector.multi_reduction <add>, %5, %cst_6 [1] : vector<8x512xf32> to vector<8xf32>
    %8 = vector.shape_cast %7 : vector<8xf32> to vector<8x1xf32>
    %9 = arith.addf %6, %8 : vector<8x1xf32>
    %c0_7 = arith.constant 0 : index
    %c0_8 = arith.constant 0 : index
    %10 = vector.load %arg8[%c0_7, %c0_8] : memref<8x1xf32, #tpu.memory_space<vmem>>, vector<8x1xf32>
    tpu.vector_store %arg8[%c0_7, %c0_8], %9 {strides = array<i32>} : memref<8x1xf32, #tpu.memory_space<vmem>>, vector<8x1xf32>,
    %c0_9 = arith.constant 0 : index
    %c0_10 = arith.constant 0 : index
    %11 = vector.load %arg9[%c0_9, %c0_10] : memref<8x1xf32, #tpu.memory_space<vmem>>, vector<8x1xf32>
    %12 = arith.mulf %5, %5 : vector<8x512xf32>
    %cst_11 = arith.constant dense<0.000000e+00> : vector<8xf32>
    %13 = vector.multi_reduction <add>, %12, %cst_11 [1] : vector<8x512xf32> to vector<8xf32>
    %14 = vector.shape_cast %13 : vector<8xf32> to vector<8x1xf32>
    %15 = arith.addf %11, %14 : vector<8x1xf32>
    %c0_12 = arith.constant 0 : index
    %c0_13 = arith.constant 0 : index
    %16 = vector.load %arg9[%c0_12, %c0_13] : memref<8x1xf32, #tpu.memory_space<vmem>>, vector<8x1xf32>
    tpu.vector_store %arg9[%c0_12, %c0_13], %15 {strides = array<i32>} : memref<8x1xf32, #tpu.memory_space<vmem>>, vector<8x1xf32>,
    %c0_14 = arith.constant 0 : index
    %c0_15 = arith.constant 0 : index
    %17 = vector.load %arg7[%c0_14, %c0_15] : memref<8x512xf32, #tpu.memory_space<vmem>>, vector<8x512xf32>
    tpu.vector_store %arg7[%c0_14, %c0_15], %5 {strides = array<i32>} : memref<8x512xf32, #tpu.memory_space<vmem>>, vector<8x512xf32>,
    %c0_i32_16 = arith.constant 0 : i32
    %18 = arith.cmpi eq, %arg0, %c0_i32_16 : i32
    %19 = arith.extui %18 : i1 to i32
    %c0_i32_17 = arith.constant 0 : i32
    %20 = arith.cmpi ne, %19, %c0_i32_17 : i32
    scf.if %20 {
      %c0_18 = arith.constant 0 : index
      %c0_19 = arith.constant 0 : index
      %21 = vector.load %arg8[%c0_18, %c0_19] : memref<8x1xf32, #tpu.memory_space<vmem>>, vector<8x1xf32>
      %cst_20 = arith.constant 0.001953125 : f32
      %22 = vector.broadcast %cst_20 : f32 to vector<8x1xf32>
      %23 = arith.mulf %21, %22 : vector<8x1xf32>
      %c0_21 = arith.constant 0 : index
      %c0_22 = arith.constant 0 : index
      %24 = vector.load %arg9[%c0_21, %c0_22] : memref<8x1xf32, #tpu.memory_space<vmem>>, vector<8x1xf32>
      %cst_23 = arith.constant 0.001953125 : f32
      %25 = vector.broadcast %cst_23 : f32 to vector<8x1xf32>
      %26 = arith.mulf %24, %25 : vector<8x1xf32>
      %27 = arith.mulf %23, %23 : vector<8x1xf32>
      %28 = arith.subf %26, %27 : vector<8x1xf32>
      %cst_24 = arith.constant 9.99999974E-6 : f32
      %29 = vector.broadcast %cst_24 : f32 to vector<8x1xf32>
      %30 = arith.addf %28, %29 : vector<8x1xf32>
      %31 = math.rsqrt %30 : vector<8x1xf32>
      %c0_25 = arith.constant 0 : index
      %c0_26 = arith.constant 0 : index
      %32 = vector.load %arg2[%c0_25, %c0_26] : memref<8x1xf32, #tpu.memory_space<vmem>>, vector<8x1xf32>
      %33 = arith.mulf %32, %31 : vector<8x1xf32>
      %c0_27 = arith.constant 0 : index
      %c0_28 = arith.constant 0 : index
      %34 = vector.load %arg3[%c0_27, %c0_28] : memref<8x1xf32, #tpu.memory_space<vmem>>, vector<8x1xf32>
      %35 = arith.mulf %23, %33 : vector<8x1xf32>
      %36 = arith.subf %34, %35 : vector<8x1xf32>
      %c0_29 = arith.constant 0 : index
      %c0_30 = arith.constant 0 : index
      %37 = vector.load %arg7[%c0_29, %c0_30] : memref<8x512xf32, #tpu.memory_space<vmem>>, vector<8x512xf32>
      %38 = vector.broadcast %33 : vector<8x1xf32> to vector<8x512xf32>
      %39 = arith.mulf %37, %38 : vector<8x512xf32>
      %40 = vector.broadcast %36 : vector<8x1xf32> to vector<8x512xf32>
      %41 = arith.addf %39, %40 : vector<8x512xf32>
      %c0_31 = arith.constant 0 : index
      %c0_32 = arith.constant 0 : index
      %42 = vector.load %arg5[%c0_31, %c0_32] : memref<8x512xf32, #tpu.memory_space<vmem>>, vector<8x512xf32>
      %43 = arith.addf %41, %42 : vector<8x512xf32>
      %cst_33 = arith.constant 0.000000e+00 : f32
      %44 = vector.broadcast %cst_33 : f32 to vector<8x512xf32>
      %45 = arith.maximumf %43, %44 : vector<8x512xf32>
      %c0_34 = arith.constant 0 : index
      %c0_35 = arith.constant 0 : index
      %46 = vector.load %arg6[%c0_34, %c0_35] : memref<8x512xf32, #tpu.memory_space<vmem>>, vector<8x512xf32>
      tpu.vector_store %arg6[%c0_34, %c0_35], %45 {strides = array<i32>} : memref<8x512xf32, #tpu.memory_space<vmem>>, vector<8x512xf32>,
    } else {
    }
    return
  }
  func.func @transform_0(%arg0: i32) -> (i32, i32) {
    %c0_i32 = arith.constant 0 : i32
    %c0_i32_0 = arith.constant 0 : i32
    %c0_i32_1 = arith.constant 0 : i32
    return %c0_i32, %c0_i32_0 : i32, i32
  }
  func.func @transform_1(%arg0: i32) -> (i32, i32) {
    %c0_i32 = arith.constant 0 : i32
    %c0_i32_0 = arith.constant 0 : i32
    %c0_i32_1 = arith.constant 0 : i32
    return %c0_i32, %c0_i32_0 : i32, i32
  }
  func.func @transform_2(%arg0: i32) -> (i32, i32) {
    %c0_i32 = arith.constant 0 : i32
    %c0_i32_0 = arith.constant 0 : i32
    %c0_i32_1 = arith.constant 0 : i32
    return %c0_i32, %c0_i32_0 : i32, i32
  }
  func.func @transform_3(%arg0: i32) -> (i32, i32) {
    %c0_i32 = arith.constant 0 : i32
    %c0_i32_0 = arith.constant 0 : i32
    return %c0_i32, %arg0 : i32, i32
  }
  func.func @transform_4(%arg0: i32) -> (i32, i32) {
    %c0_i32 = arith.constant 0 : i32
    %c0_i32_0 = arith.constant 0 : i32
    %c0_i32_1 = arith.constant 0 : i32
    return %c0_i32, %c0_i32_0 : i32, i32
  }
  func.func @transform_5(%arg0: i32) -> (i32, i32) {
    %c0_i32 = arith.constant 0 : i32
    %c0_i32_0 = arith.constant 0 : i32
    %c0_i32_1 = arith.constant 0 : i32
    return %c0_i32, %c0_i32_0 : i32, i32
  }
}

</mosaic_0001>

<bundles_post_ra>
// kernel: basic_block_forward.2
= control target key start
LH: loop header
LB: loop body
LE: loop exit
PB: predicated region body
PF: predicated region fallthrough
CT: control target
= control target key end

     0   :  { %v384_v1 = vmov 0   ;;  %vm138_vm0 = vcmask 1043456   ;;  %vm134_vm1 = vcmask 588800   ;;  %vm22_vm2 = vcmask 7168   ;;  %s484_s3 = inlined_call_operand.vmem [shape: bf16[72,512], index: 3, kind: input, shape index: {}]   ;;  %s485_s0 = inlined_call_operand.vmem [shape: bf16[8,72], index: 0, kind: input, shape index: {}]   ;;  %s486_s1 = inlined_call_operand.vmem [shape: f32[8,1], index: 1, kind: input, shape index: {}]   ;;  %s487_s2 = inlined_call_operand.vmem [shape: f32[8,1], index: 2, kind: input, shape index: {}]   ;;  %s488_s4 = inlined_call_operand.vmem [shape: bf16[8,512], index: 4, kind: output, shape index: {}]  }
   0x1   :  { %v354_v0 = vld [vmem:[%s484_s3 + $0x4] ss:$16 sps:$4 sm:$0xff]   ;;  %183 = vmatprep.mubr.bf16.mxu0 %v384_v1  ;;  %224 = vmatprep.mubr.bf16.mxu1 %v384_v1  ;;  %v356_v2 = vld [vmem:[%s484_s3 + $0xc] ss:$16 sps:$4 sm:$0xff]   ;;  %v358_v3 = vld [vmem:[%s484_s3] ss:$16 sps:$4 sm:$0xff]  }
   0x2   :  { %352 = vset.pattern.permute.xlu1 %v384_v1  ;;  %353 = vset.pattern.permute.xlu0 %v384_v1  ;;  %v359_v4 = vld [vmem:[%s484_s3 + $0x8] ss:$16 sps:$4 sm:$0xff]   ;;  %v360_v5 = vld [vmem:[%s484_s3 + $0x24] ss:$16 sps:$4 sm:$0xff]   ;;  %v362_v6 = vld [vmem:[%s484_s3 + $0x2c] ss:$16 sps:$4 sm:$0xff]  }
   0x3   :  { %151 = vmatprep.subr.bf16.mxu0 %v354_v0  ;;  %192 = vmatprep.subr.bf16.mxu1 %v356_v2  ;;  %v364_v7 = vld [vmem:[%s484_s3 + $0x20] ss:$16 sps:$4 sm:$0xff]   ;;  %v365_v8 = vld [vmem:[%s484_s3 + $0x28] ss:$16 sps:$4 sm:$0xff]   ;;  %v366_v9 = vld [vmem:[%s484_s3 + $0x44] ss:$16 sps:$4 sm:$0xff]  }
   0x4   :  { %152 = vmatpush1.bf16.msra.mxu0 %v358_v3  ;;  %193 = vmatpush1.bf16.msra.mxu1 %v359_v4  ;;  %v368_v10 = vld [vmem:[%s484_s3 + $0x4c] ss:$16 sps:$4 sm:$0xff]   ;;  %v370_v11 = vld [vmem:[%s484_s3 + $0x40] ss:$16 sps:$4 sm:$0xff]   ;;  %v371_v12 = vld [vmem:[%s484_s3 + $0x48] ss:$16 sps:$4 sm:$0xff]  }
   0x5   :  { %153 = vmatprep.subr.bf16.mxu0 %v360_v5  ;;  %194 = vmatprep.subr.bf16.mxu1 %v362_v6  ;;  %v372_v13 = vld [vmem:[%s484_s3 + $0x64] ss:$16 sps:$4 sm:$0xff]   ;;  %v374_v14 = vld [vmem:[%s484_s3 + $0x6c] ss:$16 sps:$4 sm:$0xff]   ;;  %v376_v17 = vld [vmem:[%s484_s3 + $0x60] ss:$16 sps:$4 sm:$0xff]  }
   0x6   :  { %v42_v15 = vld [vmem:[%s484_s3 + $0x80] sm:$0xff]  ;;  %v43_v16 = vld [vmem:[%s484_s3 + $0x88] sm:$0xff]  ;;  %v385_v26 = vmov 0.0  }
   0x7   :  { %v377_v18 = vld [vmem:[%s484_s3 + $0x68] ss:$16 sps:$4 sm:$0xff]   ;;  %v339_v19 = vcombine.high %v42_v15, %v42_v15  ;;  %v341_v20 = vcombine.high %v43_v16, %v43_v16  ;;  %v338_v21 = vcombine.low %v42_v15, %v42_v15  ;;  %v340_v22 = vcombine.low %v43_v16, %v43_v16  ;;  %v25_v25 = vld [vmem:[%s485_s0] sm:$0xf]  ;;  %23 = vst.msk [vmem:[#allocation3] sm:$0xff] %vm22_vm2, %v385_v26 }
   0x8   :  { %154 = vmatpush1.bf16.msra.mxu0 %v364_v7  ;;  %195 = vmatpush1.bf16.msra.mxu1 %v365_v8  ;;  %24 = vst.msk [vmem:[#allocation4] sm:$0xff] %vm22_vm2, %v385_v26  ;;  %v269_v58 = vld [vmem:[%s486_s1] sm:$0xff] }
   0x9   :  { %155 = vmatprep.subr.bf16.mxu0 %v366_v9  ;;  %196 = vmatprep.subr.bf16.mxu1 %v368_v10  ;;  %v140_v23 = vsel %vm138_vm0, %v338_v21, 0  ;;  %v146_v24 = vsel %vm138_vm0, %v340_v22, 0  ;;  %v271_v61 = vld [vmem:[%s487_s2] sm:$0xff] }
   0xc   :  { %156 = vmatpush1.bf16.msra.mxu0 %v370_v11  ;;  %197 = vmatpush1.bf16.msra.mxu1 %v371_v12 }
   0xd   :  { %157 = vmatprep.subr.bf16.mxu0 %v372_v13  ;;  %198 = vmatprep.subr.bf16.mxu1 %v374_v14 }
   0xe   :  { %v233_v45 = vld [vmem:[#allocation3] sm:$0xff] }
   0xf   :  { %v242_v48 = vld [vmem:[#allocation4] sm:$0xff] }
  0x10   :  { %158 = vmatpush1.bf16.msra.mxu0 %v376_v17  ;;  %199 = vmatpush1.bf16.msra.mxu1 %v377_v18 }
  0x11   :  { %342 = vmatprep.subr.msk.bf16.mxu0 %vm138_vm0, %v339_v19  ;;  %344 = vmatprep.subr.msk.bf16.mxu1 %vm138_vm0, %v341_v20 }
  0x14   :  { %160 = vmatpush1.bf16.msra.mxu0 %v140_v23  ;;  %201 = vmatpush1.bf16.msra.mxu1 %v146_v24 }
  0x17   :  { %343 = vmatmul.mubr.msk.bf16.vlgmr.msra.gmra.mrb[0].mxu0 %vm134_vm1, %v25_v25  ;;  %345 = vmatmul.mubr.msk.bf16.vlgmr.msra.gmra.mrb[0].mxu1 %vm134_vm1, %v25_v25 }
  0xea   :  { %v185_v27 = vpop.f32.mrb[0].mxu0  ;;  %v226_v28 = vpop.f32.mrb[0].mxu1 }
  0xeb   :  { %v243_v29 = vmul.f32 %v185_v27, %v185_v27  ;;  %v187_v30 = vpop.f32.mrb[1].mxu0  ;;  %v228_v31 = vpop.f32.mrb[1].mxu1  ;;  %v245_v32 = vmul.f32 %v226_v28, %v226_v28 }
  0xec   :  { %v234_v33 = vadd.f32 %v187_v30, %v185_v27  ;;  %v244_v34 = vmul.f32 %v187_v30, %v187_v30  ;;  %v189_v35 = vpop.f32.mrb[2].mxu0  ;;  %v230_v36 = vpop.f32.mrb[2].mxu1  ;;  %v246_v42 = vmul.f32 %v228_v31, %v228_v31 }
  0xed   :  { %v190_v37 = vpop.f32.mrb[3].mxu0  ;;  %v231_v38 = vpop.f32.mrb[3].mxu1 }
  0xee   :  { %v235_v39 = vadd.f32 %v234_v33, %v226_v28  ;;  %v247_v40 = vadd.f32 %v244_v34, %v243_v29 }
  0xf0   :  { %v236_v41 = vadd.f32 %v235_v39, %v228_v31  ;;  %v248_v43 = vadd.f32 %v247_v40, %v245_v32 }
  0xf2   :  { %237 = vadd.xlane.f32.xlu0 %v236_v41  ;;  %v249_v44 = vadd.f32 %v248_v43, %v246_v42 }
  0xf6   :  { %250 = vadd.xlane.f32.xlu0 %v249_v44 }
 0x17f   :  { %v238_v46 = vpop.xlane.xlu0 %237 }
 0x180   :  { %v239_v47 = vadd.f32 %v238_v46, %v233_v45 }
 0x182   :  { %241 = vst.msk [vmem:[#allocation3] sm:$0xff] %vm22_vm2, %v239_v47 }
 0x183   :  { %v251_v49 = vpop.xlane.xlu0 %250 }
 0x184   :  { %v252_v50 = vadd.f32 %v251_v49, %v242_v48 }
 0x186   :  { %253 = vst.msk [vmem:[#allocation4] sm:$0xff] %vm22_vm2, %v252_v50 }
 0x189   :  { %v261_v51 = vld [vmem:[#allocation3] sm:$0xff] }
 0x18a   :  { %v262_v52 = vmul.f32 0.001953125, %v261_v51 }
 0x18c   :  { %v265_v55 = vmul.f32 %v262_v52, %v262_v52 }
 0x18d   :  { %v263_v53 = vld [vmem:[#allocation4] sm:$0xff] }
 0x18e   :  { %v264_v54 = vmul.f32 0.001953125, %v263_v53 }
 0x190   :  { %v266_v56 = vsub.f32 %v264_v54, %v265_v55 }
 0x192   :  { %v267_v57 = vadd.f32 1e-05, %v266_v56 }
 0x194   :  { %382 = vrsqrt.f32 %v267_v57 }
 0x19e   :  { %v383_v59 = vpop.eup %382 }
 0x19f   :  { %v270_v60 = vmul.f32 %v383_v59, %v269_v58 }
 0x1a1   :  { %280 = vperm.xlu1 %352, %v270_v60   ;;  %v272_v62 = vmul.f32 %v270_v60, %v262_v52 }
 0x1a3   :  { %v273_v63 = vsub.f32 %v271_v61, %v272_v62 }
 0x1a5   :  { %289 = vperm.xlu1 %352, %v273_v63  }
 0x220   :  { %v281_v0 = vpop.permute.xlu1 %280 }
 0x221   :  { %v283_v1 = vmul.f32 %v281_v0, %v185_v27  ;;  %v284_v2 = vmul.f32 %v281_v0, %v187_v30  ;;  %v285_v3 = vmul.f32 %v281_v0, %v226_v28  ;;  %v286_v4 = vmul.f32 %v281_v0, %v228_v31 }
 0x224   :  { %v290_v5 = vpop.permute.xlu1 %289 }
 0x225   :  { %v292_v6 = vadd.f32 %v290_v5, %v283_v1  ;;  %v293_v7 = vadd.f32 %v290_v5, %v284_v2  ;;  %v294_v8 = vadd.f32 %v290_v5, %v285_v3  ;;  %v295_v9 = vadd.f32 %v290_v5, %v286_v4 }
 0x227   :  { %v296_v10 = vmax.f32 %v292_v6, 0.0  ;;  %v297_v11 = vmax.f32 %v293_v7, 0.0  ;;  %v298_v12 = vmax.f32 %v294_v8, 0.0  ;;  %v299_v13 = vmax.f32 %v295_v9, 0.0 }
 0x229   :  { %v348_v14 = vpack.c.bf16 %v297_v11, %v296_v10  ;;  %v349_v15 = vpack.c.bf16 %v299_v13, %v298_v12 }
 0x22b   :  { %316 = vst [vmem:[%s488_s4] sm:$0xff] %v348_v14  ;;  %317 = vst [vmem:[%s488_s4 + $0x8] sm:$0xff] %v349_v15 }

// kernel: basic_block_forward.3
= control target key start
LH: loop header
LB: loop body
LE: loop exit
PB: predicated region body
PF: predicated region fallthrough
CT: control target
= control target key end

     0   :  { %v377_v1 = vmov 0   ;;  %vm141_vm0 = vcmask 1043456   ;;  %vm137_vm1 = vcmask 588800   ;;  %vm25_vm2 = vcmask 7168   ;;  %s500_s3 = inlined_call_operand.vmem [shape: bf16[72,512], index: 3, kind: input, shape index: {}]   ;;  %s501_s0 = inlined_call_operand.vmem [shape: bf16[8,72], index: 0, kind: input, shape index: {}]   ;;  %s502_s1 = inlined_call_operand.vmem [shape: f32[8,1], index: 1, kind: input, shape index: {}]   ;;  %s503_s2 = inlined_call_operand.vmem [shape: f32[8,1], index: 2, kind: input, shape index: {}]   ;;  %s504_s4 = inlined_call_operand.vmem [shape: f32[8,512], index: 4, kind: input, shape index: {}]   ;;  %s505_s5 = inlined_call_operand.vmem [shape: f32[8,512], index: 5, kind: output, shape index: {}]  }
   0x1   :  { %v347_v0 = vld [vmem:[%s500_s3 + $0x4] ss:$16 sps:$4 sm:$0xff]   ;;  %186 = vmatprep.mubr.bf16.mxu0 %v377_v1  ;;  %227 = vmatprep.mubr.bf16.mxu1 %v377_v1  ;;  %v349_v2 = vld [vmem:[%s500_s3 + $0xc] ss:$16 sps:$4 sm:$0xff]   ;;  %v351_v3 = vld [vmem:[%s500_s3] ss:$16 sps:$4 sm:$0xff]  }
   0x2   :  { %345 = vset.pattern.permute.xlu1 %v377_v1  ;;  %346 = vset.pattern.permute.xlu0 %v377_v1  ;;  %v352_v4 = vld [vmem:[%s500_s3 + $0x8] ss:$16 sps:$4 sm:$0xff]   ;;  %v353_v5 = vld [vmem:[%s500_s3 + $0x24] ss:$16 sps:$4 sm:$0xff]   ;;  %v355_v6 = vld [vmem:[%s500_s3 + $0x2c] ss:$16 sps:$4 sm:$0xff]  }
   0x3   :  { %154 = vmatprep.subr.bf16.mxu0 %v347_v0  ;;  %195 = vmatprep.subr.bf16.mxu1 %v349_v2  ;;  %v357_v7 = vld [vmem:[%s500_s3 + $0x20] ss:$16 sps:$4 sm:$0xff]   ;;  %v358_v8 = vld [vmem:[%s500_s3 + $0x28] ss:$16 sps:$4 sm:$0xff]   ;;  %v359_v9 = vld [vmem:[%s500_s3 + $0x44] ss:$16 sps:$4 sm:$0xff]  }
   0x4   :  { %155 = vmatpush1.bf16.msra.mxu0 %v351_v3  ;;  %196 = vmatpush1.bf16.msra.mxu1 %v352_v4  ;;  %v361_v10 = vld [vmem:[%s500_s3 + $0x4c] ss:$16 sps:$4 sm:$0xff]   ;;  %v363_v11 = vld [vmem:[%s500_s3 + $0x40] ss:$16 sps:$4 sm:$0xff]   ;;  %v364_v12 = vld [vmem:[%s500_s3 + $0x48] ss:$16 sps:$4 sm:$0xff]  }
   0x5   :  { %156 = vmatprep.subr.bf16.mxu0 %v353_v5  ;;  %197 = vmatprep.subr.bf16.mxu1 %v355_v6  ;;  %v365_v13 = vld [vmem:[%s500_s3 + $0x64] ss:$16 sps:$4 sm:$0xff]   ;;  %v367_v14 = vld [vmem:[%s500_s3 + $0x6c] ss:$16 sps:$4 sm:$0xff]   ;;  %v369_v17 = vld [vmem:[%s500_s3 + $0x60] ss:$16 sps:$4 sm:$0xff]  }
   0x6   :  { %v45_v15 = vld [vmem:[%s500_s3 + $0x80] sm:$0xff]  ;;  %v46_v16 = vld [vmem:[%s500_s3 + $0x88] sm:$0xff]  ;;  %v378_v26 = vmov 0.0  }
   0x7   :  { %v370_v18 = vld [vmem:[%s500_s3 + $0x68] ss:$16 sps:$4 sm:$0xff]   ;;  %v336_v19 = vcombine.high %v45_v15, %v45_v15  ;;  %v338_v20 = vcombine.high %v46_v16, %v46_v16  ;;  %v335_v21 = vcombine.low %v45_v15, %v45_v15  ;;  %v337_v22 = vcombine.low %v46_v16, %v46_v16  ;;  %v28_v25 = vld [vmem:[%s501_s0] sm:$0xf]  ;;  %26 = vst.msk [vmem:[#allocation3] sm:$0xff] %vm25_vm2, %v378_v26 }
   0x8   :  { %157 = vmatpush1.bf16.msra.mxu0 %v357_v7  ;;  %198 = vmatpush1.bf16.msra.mxu1 %v358_v8  ;;  %27 = vst.msk [vmem:[#allocation4] sm:$0xff] %vm25_vm2, %v378_v26  ;;  %v272_v58 = vld [vmem:[%s502_s1] sm:$0xff]  ;;  %v300_v6 = vld [vmem:[%s504_s4 + $0x8] sm:$0xff]  ;;  %v301_v7 = vld [vmem:[%s504_s4 + $0x10] sm:$0xff] }
   0x9   :  { %158 = vmatprep.subr.bf16.mxu0 %v359_v9  ;;  %199 = vmatprep.subr.bf16.mxu1 %v361_v10  ;;  %v143_v23 = vsel %vm141_vm0, %v335_v21, 0  ;;  %v149_v24 = vsel %vm141_vm0, %v337_v22, 0  ;;  %v274_v61 = vld [vmem:[%s503_s2] sm:$0xff]  ;;  %v302_v8 = vld [vmem:[%s504_s4 + $0x18] sm:$0xff] }
   0xa   :  { %v299_v5 = vld [vmem:[%s504_s4] sm:$0xff] }
   0xc   :  { %159 = vmatpush1.bf16.msra.mxu0 %v363_v11  ;;  %200 = vmatpush1.bf16.msra.mxu1 %v364_v12 }
   0xd   :  { %160 = vmatprep.subr.bf16.mxu0 %v365_v13  ;;  %201 = vmatprep.subr.bf16.mxu1 %v367_v14 }
   0xe   :  { %v236_v45 = vld [vmem:[#allocation3] sm:$0xff] }
   0xf   :  { %v245_v48 = vld [vmem:[#allocation4] sm:$0xff] }
  0x10   :  { %161 = vmatpush1.bf16.msra.mxu0 %v369_v17  ;;  %202 = vmatpush1.bf16.msra.mxu1 %v370_v18 }
  0x11   :  { %339 = vmatprep.subr.msk.bf16.mxu0 %vm141_vm0, %v336_v19  ;;  %341 = vmatprep.subr.msk.bf16.mxu1 %vm141_vm0, %v338_v20 }
  0x14   :  { %163 = vmatpush1.bf16.msra.mxu0 %v143_v23  ;;  %204 = vmatpush1.bf16.msra.mxu1 %v149_v24 }
  0x17   :  { %340 = vmatmul.mubr.msk.bf16.vlgmr.msra.gmra.mrb[0].mxu0 %vm137_vm1, %v28_v25  ;;  %342 = vmatmul.mubr.msk.bf16.vlgmr.msra.gmra.mrb[0].mxu1 %vm137_vm1, %v28_v25 }
  0xea   :  { %v188_v27 = vpop.f32.mrb[0].mxu0  ;;  %v229_v28 = vpop.f32.mrb[0].mxu1 }
  0xeb   :  { %v246_v29 = vmul.f32 %v188_v27, %v188_v27  ;;  %v190_v30 = vpop.f32.mrb[1].mxu0  ;;  %v231_v31 = vpop.f32.mrb[1].mxu1  ;;  %v248_v32 = vmul.f32 %v229_v28, %v229_v28 }
  0xec   :  { %v237_v33 = vadd.f32 %v190_v30, %v188_v27  ;;  %v247_v34 = vmul.f32 %v190_v30, %v190_v30  ;;  %v192_v35 = vpop.f32.mrb[2].mxu0  ;;  %v233_v36 = vpop.f32.mrb[2].mxu1  ;;  %v249_v42 = vmul.f32 %v231_v31, %v231_v31 }
  0xed   :  { %v193_v37 = vpop.f32.mrb[3].mxu0  ;;  %v234_v38 = vpop.f32.mrb[3].mxu1 }
  0xee   :  { %v238_v39 = vadd.f32 %v237_v33, %v229_v28  ;;  %v250_v40 = vadd.f32 %v247_v34, %v246_v29 }
  0xf0   :  { %v239_v41 = vadd.f32 %v238_v39, %v231_v31  ;;  %v251_v43 = vadd.f32 %v250_v40, %v248_v32 }
  0xf2   :  { %240 = vadd.xlane.f32.xlu0 %v239_v41  ;;  %v252_v44 = vadd.f32 %v251_v43, %v249_v42 }
  0xf6   :  { %253 = vadd.xlane.f32.xlu0 %v252_v44 }
 0x17f   :  { %v241_v46 = vpop.xlane.xlu0 %240 }
 0x180   :  { %v242_v47 = vadd.f32 %v241_v46, %v236_v45 }
 0x182   :  { %244 = vst.msk [vmem:[#allocation3] sm:$0xff] %vm25_vm2, %v242_v47 }
 0x183   :  { %v254_v49 = vpop.xlane.xlu0 %253 }
 0x184   :  { %v255_v50 = vadd.f32 %v254_v49, %v245_v48 }
 0x186   :  { %256 = vst.msk [vmem:[#allocation4] sm:$0xff] %vm25_vm2, %v255_v50 }
 0x189   :  { %v264_v51 = vld [vmem:[#allocation3] sm:$0xff] }
 0x18a   :  { %v265_v52 = vmul.f32 0.001953125, %v264_v51 }
 0x18c   :  { %v268_v55 = vmul.f32 %v265_v52, %v265_v52 }
 0x18d   :  { %v266_v53 = vld [vmem:[#allocation4] sm:$0xff] }
 0x18e   :  { %v267_v54 = vmul.f32 0.001953125, %v266_v53 }
 0x190   :  { %v269_v56 = vsub.f32 %v267_v54, %v268_v55 }
 0x192   :  { %v270_v57 = vadd.f32 1e-05, %v269_v56 }
 0x194   :  { %375 = vrsqrt.f32 %v270_v57 }
 0x19e   :  { %v376_v59 = vpop.eup %375 }
 0x19f   :  { %v273_v60 = vmul.f32 %v376_v59, %v272_v58 }
 0x1a1   :  { %283 = vperm.xlu1 %345, %v273_v60   ;;  %v275_v62 = vmul.f32 %v273_v60, %v265_v52 }
 0x1a3   :  { %v276_v63 = vsub.f32 %v274_v61, %v275_v62 }
 0x1a5   :  { %292 = vperm.xlu1 %345, %v276_v63  }
 0x220   :  { %v284_v0 = vpop.permute.xlu1 %283 }
 0x221   :  { %v286_v1 = vmul.f32 %v284_v0, %v188_v27  ;;  %v287_v2 = vmul.f32 %v284_v0, %v190_v30  ;;  %v288_v3 = vmul.f32 %v284_v0, %v229_v28  ;;  %v289_v4 = vmul.f32 %v284_v0, %v231_v31 }
 0x224   :  { %v293_v9 = vpop.permute.xlu1 %292 }
 0x225   :  { %v295_v10 = vadd.f32 %v293_v9, %v286_v1  ;;  %v296_v11 = vadd.f32 %v293_v9, %v287_v2  ;;  %v297_v12 = vadd.f32 %v293_v9, %v288_v3  ;;  %v298_v13 = vadd.f32 %v293_v9, %v289_v4 }
 0x227   :  { %v303_v14 = vadd.f32 %v299_v5, %v295_v10  ;;  %v304_v15 = vadd.f32 %v300_v6, %v296_v11  ;;  %v305_v16 = vadd.f32 %v301_v7, %v297_v12  ;;  %v306_v17 = vadd.f32 %v302_v8, %v298_v13 }
 0x229   :  { %v307_v18 = vmax.f32 %v303_v14, 0.0  ;;  %v308_v19 = vmax.f32 %v304_v15, 0.0  ;;  %v309_v20 = vmax.f32 %v305_v16, 0.0  ;;  %v310_v21 = vmax.f32 %v306_v17, 0.0 }
 0x22b   :  { %311 = vst [vmem:[%s505_s5] sm:$0xff] %v307_v18  ;;  %312 = vst [vmem:[%s505_s5 + $0x8] sm:$0xff] %v308_v19 }
 0x22c   :  { %313 = vst [vmem:[%s505_s5 + $0x10] sm:$0xff] %v309_v20  ;;  %314 = vst [vmem:[%s505_s5 + $0x18] sm:$0xff] %v310_v21 }

</bundles_post_ra>
